<compile_context>
chip_gen: v6e
topology: v6e:2x2x1
jax: 0.10.0
libtpu: 0.0.40
codegen_flags: <defaults>
</compile_context>

<pallas_src>
import functools

import jax
import jax.numpy as jnp
import numpy as np
from jax.experimental import pallas as pl
from jax.experimental.pallas import tpu as pltpu


def _sigmoid(x):
    # sigmoid(x) == 0.5 * tanh(0.5 * x) + 0.5 : one EUP op per element
    # (vs exp + reciprocal), VPU ops are free relative to the EUP/HBM bottleneck.
    return 0.5 * jnp.tanh(0.5 * x) + 0.5


def _decode_kernel(pred_ref, out_ref, *, anchors_px, stride_w, stride_h,
                   feat_w, hw_tile):
    # pred_ref / out_ref : (1, A, attrs, hw_tile) VMEM tiles.
    # attrs maps to sublanes, H*W (chunked) maps to the 128-wide lane axis.
    p = pred_ref[0]                                   # (A, attrs, hw_tile)

    # One full-tile sigmoid + one aligned full-tile store; rows 0..3 of every
    # anchor are overwritten below with the decoded box values.
    s = _sigmoid(p)
    out_ref[0] = s

    # grid_x / grid_y generated in-kernel (no HBM input): flat spatial index
    # -> (col, row).  "+0.5 before floor" keeps the divide robust to rounding.
    base = pl.program_id(1) * hw_tile
    idx = (jax.lax.broadcasted_iota(jnp.int32, (1, hw_tile), 1) + base
           ).astype(jnp.float32)[0]                   # (hw_tile,)
    gy = jnp.floor((idx + 0.5) * np.float32(1.0 / feat_w))
    gx = idx - gy * np.float32(feat_w)

    for a, (aw, ah) in enumerate(anchors_px):         # static unroll, A small
        out_ref[0, a, 0, :] = (s[a, 0, :] + gx) * stride_w
        out_ref[0, a, 1, :] = (s[a, 1, :] + gy) * stride_h
        # raw pixel anchors: exp(w) * (anchor/stride) * stride == exp(w) * anchor
        out_ref[0, a, 2, :] = jnp.exp(p[a, 2, :]) * aw
        out_ref[0, a, 3, :] = jnp.exp(p[a, 3, :]) * ah


def decode_box(pred_nchw, anchors, num_classes, img_size, feature_size,
               *, per_buffer_bytes=4 << 20):
    """JAX/Pallas equivalent of DecodeBox.forward.

    pred_nchw : (B, A*(5+num_classes), H, W) float32 (NCHW, like PyTorch)
    anchors   : list of (anchor_w, anchor_h) in image pixels
    returns   : (B, A*H*W, 5+num_classes) float32
    """
    anchors = np.asarray(anchors, dtype=np.float32)
    num_anchors = anchors.shape[0]
    attrs = 5 + num_classes
    B, C, H, W = pred_nchw.shape
    assert C == num_anchors * attrs
    assert (W, H) == (feature_size[0], feature_size[1])
    HW = H * W

    stride_w = float(img_size[0]) / float(feature_size[0])
    stride_h = float(img_size[1]) / float(feature_size[1])

    # ---- spatial tile: multiple of 128 lanes, capped so the block (all
    # anchors x all attrs x hw_tile) stays small vs VMEM on every generation.
    row_bytes = num_anchors * attrs * 4
    max_tile = max(128, (per_buffer_bytes // row_bytes) // 128 * 128)
    hw128 = ((HW + 127) // 128) * 128
    hw_tile = int(min(max_tile, hw128))
    n_hw = int(pl.cdiv(HW, hw_tile))
    HW_pad = n_hw * hw_tile

    # NCHW -> (B, A, attrs, H*W)  (pure reshape), pad H*W up to the tile grid.
    pred = pred_nchw.reshape(B, num_anchors, attrs, HW)
    if HW_pad != HW:
        pred = jnp.pad(pred, ((0, 0), (0, 0), (0, 0), (0, HW_pad - HW)))

    block_bytes = num_anchors * attrs * hw_tile * 4
    # double-buffered in + out blocks, with headroom; explicit for v5e's
    # small default scoped limit, capped under v7x's 64 MiB physical VMEM.
    vmem_limit = int(min(64 << 20, max(32 << 20, 6 * block_bytes)))

    kernel = functools.partial(
        _decode_kernel,
        anchors_px=tuple((float(aw), float(ah)) for aw, ah in anchors),
        stride_w=stride_w,
        stride_h=stride_h,
        feat_w=float(W),
        hw_tile=hw_tile,
    )

    out = pl.pallas_call(
        kernel,
        out_shape=jax.ShapeDtypeStruct((B, num_anchors, attrs, HW_pad),
                                       jnp.float32),
        grid_spec=pltpu.PrefetchScalarGridSpec(
            num_scalar_prefetch=0,
            grid=(B, n_hw),
            in_specs=[pl.BlockSpec((1, num_anchors, attrs, hw_tile),
                                   lambda b, h: (b, 0, 0, h))],
            out_specs=pl.BlockSpec((1, num_anchors, attrs, hw_tile),
                                   lambda b, h: (b, 0, 0, h)),
        ),
        compiler_params=pltpu.CompilerParams(
            dimension_semantics=("parallel", "parallel"),
            vmem_limit_bytes=vmem_limit,
        ),
    )(pred)

    # Strip spatial pad, then (B,A,attrs,HW) -> (B,A,HW,attrs) -> (B,A*HW,attrs).
    # TODO(synk): the final (attrs,HW)->(HW,attrs) permute is left to XLA on
    # purpose: fusing it into the kernel would make the store lane-sparse
    # (attrs << 128), which the lane-dense-store rule says costs more here.
    out = out[..., :HW]
    return out.transpose(0, 1, 3, 2).reshape(B, num_anchors * HW, attrs)


def _reference(pred_nchw, anchors, num_classes, img_size, feature_size):
    """Pure-JAX reference replicating the PyTorch forward exactly."""
    anchors = np.asarray(anchors, dtype=np.float32)
    A = anchors.shape[0]
    attrs = 5 + num_classes
    B, _, H, W = pred_nchw.shape
    stride_w = img_size[0] / feature_size[0]
    stride_h = img_size[1] / feature_size[1]

    p = pred_nchw.reshape(B, A, attrs, H, W).transpose(0, 1, 3, 4, 2)  # (B,A,H,W,attrs)
    gx = jnp.tile(jnp.arange(W, dtype=jnp.float32)[None, :], (H, 1))
    gy = jnp.tile(jnp.arange(H, dtype=jnp.float32)[:, None], (1, W))
    aw = (anchors[:, 0] / stride_w).reshape(1, A, 1, 1)
    ah = (anchors[:, 1] / stride_h).reshape(1, A, 1, 1)

    bx = jax.nn.sigmoid(p[..., 0]) + gx
    by = jax.nn.sigmoid(p[..., 1]) + gy
    bw = jnp.exp(p[..., 2]) * aw
    bh = jnp.exp(p[..., 3]) * ah
    conf = jax.nn.sigmoid(p[..., 4])
    cls = jax.nn.sigmoid(p[..., 5:])
    boxes = jnp.stack([bx, by, bw, bh], axis=-1).reshape(B, -1, 4)
    scale = jnp.array([stride_w, stride_h, stride_w, stride_h], dtype=jnp.float32)
    return jnp.concatenate(
        [boxes * scale, conf.reshape(B, -1, 1), cls.reshape(B, -1, num_classes)],
        axis=-1,
    )


if __name__ == "__main__":
    # Small, deterministic configuration consistent with the module:
    anchors = [(10.0, 13.0), (16.0, 30.0), (33.0, 23.0)]   # 3 anchors, image px
    num_classes = 4
    batch = 2
    img_size = (128, 128)        # (img_w, img_h)
    feature_size = (16, 16)      # (feat_w, feat_h)  -> stride 8
    attrs = 5 + num_classes
    C = len(anchors) * attrs

    key = jax.random.PRNGKey(0)
    x = jax.random.normal(
        key, (batch, C, feature_size[1], feature_size[0]), dtype=jnp.float32
    )

    out = decode_box(x, anchors, num_classes, img_size, feature_size)
    out = jax.block_until_ready(out)

    ref = _reference(x, anchors, num_classes, img_size, feature_size)
    np.testing.assert_allclose(np.asarray(out), np.asarray(ref), rtol=1e-5, atol=1e-5)

    print("KERNEL_OK")
</pallas_src>

<mosaic_0001>
module attributes {stable_mosaic.version = 11 : i64} {
  func.func @_decode_kernel(%arg0: i32, %arg1: i32, %arg2: memref<1x3x9x256xf32, #tpu.memory_space<vmem>>, %arg3: memref<1x3x9x256xf32, #tpu.memory_space<vmem>>) attributes {dimension_semantics = [#tpu.dimension_semantics<parallel>, #tpu.dimension_semantics<parallel>], iteration_bounds = array<i64: 2, 1>, scalar_prefetch = 0 : i64, scratch_operands = 0 : i64, tpu.core_type = #tpu.core_type<tc>, window_params = [{transform_indices = @transform_0, window_bounds = array<i64: 1, 3, 9, 256>}, {transform_indices = @transform_1, window_bounds = array<i64: 1, 3, 9, 256>}]} {
    %c0 = arith.constant 0 : index
    %c0_0 = arith.constant 0 : index
    %c0_1 = arith.constant 0 : index
    %c0_2 = arith.constant 0 : index
    %0 = vector.load %arg2[%c0, %c0_0, %c0_1, %c0_2] : memref<1x3x9x256xf32, #tpu.memory_space<vmem>>, vector<1x3x9x256xf32>
    %1 = vector.shape_cast %0 : vector<1x3x9x256xf32> to vector<3x9x256xf32>
    %cst = arith.constant 5.000000e-01 : f32
    %2 = vector.broadcast %cst : f32 to vector<3x9x256xf32>
    %3 = arith.mulf %2, %1 : vector<3x9x256xf32>
    %4 = math.tanh %3 : vector<3x9x256xf32>
    %cst_3 = arith.constant 5.000000e-01 : f32
    %5 = vector.broadcast %cst_3 : f32 to vector<3x9x256xf32>
    %6 = arith.mulf %5, %4 : vector<3x9x256xf32>
    %cst_4 = arith.constant 5.000000e-01 : f32
    %7 = vector.broadcast %cst_4 : f32 to vector<3x9x256xf32>
    %8 = arith.addf %6, %7 : vector<3x9x256xf32>
    %c0_5 = arith.constant 0 : index
    %c0_6 = arith.constant 0 : index
    %c0_7 = arith.constant 0 : index
    %c0_8 = arith.constant 0 : index
    %9 = vector.load %arg3[%c0_5, %c0_6, %c0_7, %c0_8] : memref<1x3x9x256xf32, #tpu.memory_space<vmem>>, vector<1x3x9x256xf32>
    %10 = vector.shape_cast %9 : vector<1x3x9x256xf32> to vector<3x9x256xf32>
    %11 = vector.shape_cast %8 : vector<3x9x256xf32> to vector<1x3x9x256xf32>
    tpu.vector_store %arg3[%c0_5, %c0_6, %c0_7, %c0_8], %11 {strides = array<i32>} : memref<1x3x9x256xf32, #tpu.memory_space<vmem>>, vector<1x3x9x256xf32>,
    %c256_i32 = arith.constant 256 : i32
    %12 = arith.muli %arg1, %c256_i32 : i32
    %13 = tpu.iota {dimensions = array<i32: 1>} : vector<1x256xi32>
    %14 = vector.broadcast %12 : i32 to vector<1x256xi32>
    %15 = arith.addi %13, %14 : vector<1x256xi32>
    %16 = arith.sitofp %15 : vector<1x256xi32> to vector<1x256xf32>
    %17 = vector.shape_cast %16 : vector<1x256xf32> to vector<256xf32>
    %cst_9 = arith.constant 5.000000e-01 : f32
    %18 = vector.broadcast %cst_9 : f32 to vector<256xf32>
    %19 = arith.addf %17, %18 : vector<256xf32>
    %cst_10 = arith.constant 6.250000e-02 : f32
    %20 = vector.broadcast %cst_10 : f32 to vector<256xf32>
    %21 = arith.mulf %19, %20 : vector<256xf32>
    %22 = math.floor %21 : vector<256xf32>
    %cst_11 = arith.constant 1.600000e+01 : f32
    %23 = vector.broadcast %cst_11 : f32 to vector<256xf32>
    %24 = arith.mulf %22, %23 : vector<256xf32>
    %25 = arith.subf %17, %24 : vector<256xf32>
    %26 = vector.extract_strided_slice %8 {offsets = [0, 0, 0], sizes = [1, 1, 256], strides = [1, 1, 1]} : vector<3x9x256xf32> to vector<1x1x256xf32>
    %27 = vector.shape_cast %26 : vector<1x1x256xf32> to vector<256xf32>
    %28 = arith.addf %27, %25 : vector<256xf32>
    %cst_12 = arith.constant 8.000000e+00 : f32
    %29 = vector.broadcast %cst_12 : f32 to vector<256xf32>
    %30 = arith.mulf %28, %29 : vector<256xf32>
    %c0_13 = arith.constant 0 : index
    %c0_14 = arith.constant 0 : index
    %c0_15 = arith.constant 0 : index
    %c0_16 = arith.constant 0 : index
    %31 = vector.load %arg3[%c0_13, %c0_14, %c0_15, %c0_16] : memref<1x3x9x256xf32, #tpu.memory_space<vmem>>, vector<1x1x1x256xf32>
    %32 = vector.shape_cast %31 : vector<1x1x1x256xf32> to vector<256xf32>
    %33 = vector.shape_cast %30 : vector<256xf32> to vector<1x1x1x256xf32>
    tpu.vector_store %arg3[%c0_13, %c0_14, %c0_15, %c0_16], %33 {strides = array<i32>} : memref<1x3x9x256xf32, #tpu.memory_space<vmem>>, vector<1x1x1x256xf32>,
    %34 = vector.extract_strided_slice %8 {offsets = [0, 1, 0], sizes = [1, 1, 256], strides = [1, 1, 1]} : vector<3x9x256xf32> to vector<1x1x256xf32>
    %35 = vector.shape_cast %34 : vector<1x1x256xf32> to vector<256xf32>
    %36 = arith.addf %35, %22 : vector<256xf32>
    %cst_17 = arith.constant 8.000000e+00 : f32
    %37 = vector.broadcast %cst_17 : f32 to vector<256xf32>
    %38 = arith.mulf %36, %37 : vector<256xf32>
    %c0_18 = arith.constant 0 : index
    %c0_19 = arith.constant 0 : index
    %c1 = arith.constant 1 : index
    %c0_20 = arith.constant 0 : index
    %39 = vector.load %arg3[%c0_18, %c0_19, %c1, %c0_20] : memref<1x3x9x256xf32, #tpu.memory_space<vmem>>, vector<1x1x1x256xf32>
    %40 = vector.shape_cast %39 : vector<1x1x1x256xf32> to vector<256xf32>
    %41 = vector.shape_cast %38 : vector<256xf32> to vector<1x1x1x256xf32>
    tpu.vector_store %arg3[%c0_18, %c0_19, %c1, %c0_20], %41 {strides = array<i32>} : memref<1x3x9x256xf32, #tpu.memory_space<vmem>>, vector<1x1x1x256xf32>,
    %42 = vector.extract_strided_slice %1 {offsets = [0, 2, 0], sizes = [1, 1, 256], strides = [1, 1, 1]} : vector<3x9x256xf32> to vector<1x1x256xf32>
    %43 = vector.shape_cast %42 : vector<1x1x256xf32> to vector<256xf32>
    %44 = math.exp %43 : vector<256xf32>
    %cst_21 = arith.constant 1.000000e+01 : f32
    %45 = vector.broadcast %cst_21 : f32 to vector<256xf32>
    %46 = arith.mulf %44, %45 : vector<256xf32>
    %c0_22 = arith.constant 0 : index
    %c0_23 = arith.constant 0 : index
    %c2 = arith.constant 2 : index
    %c0_24 = arith.constant 0 : index
    %47 = vector.load %arg3[%c0_22, %c0_23, %c2, %c0_24] : memref<1x3x9x256xf32, #tpu.memory_space<vmem>>, vector<1x1x1x256xf32>
    %48 = vector.shape_cast %47 : vector<1x1x1x256xf32> to vector<256xf32>
    %49 = vector.shape_cast %46 : vector<256xf32> to vector<1x1x1x256xf32>
    tpu.vector_store %arg3[%c0_22, %c0_23, %c2, %c0_24], %49 {strides = array<i32>} : memref<1x3x9x256xf32, #tpu.memory_space<vmem>>, vector<1x1x1x256xf32>,
    %50 = vector.extract_strided_slice %1 {offsets = [0, 3, 0], sizes = [1, 1, 256], strides = [1, 1, 1]} : vector<3x9x256xf32> to vector<1x1x256xf32>
    %51 = vector.shape_cast %50 : vector<1x1x256xf32> to vector<256xf32>
    %52 = math.exp %51 : vector<256xf32>
    %cst_25 = arith.constant 1.300000e+01 : f32
    %53 = vector.broadcast %cst_25 : f32 to vector<256xf32>
    %54 = arith.mulf %52, %53 : vector<256xf32>
    %c0_26 = arith.constant 0 : index
    %c0_27 = arith.constant 0 : index
    %c3 = arith.constant 3 : index
    %c0_28 = arith.constant 0 : index
    %55 = vector.load %arg3[%c0_26, %c0_27, %c3, %c0_28] : memref<1x3x9x256xf32, #tpu.memory_space<vmem>>, vector<1x1x1x256xf32>
    %56 = vector.shape_cast %55 : vector<1x1x1x256xf32> to vector<256xf32>
    %57 = vector.shape_cast %54 : vector<256xf32> to vector<1x1x1x256xf32>
    tpu.vector_store %arg3[%c0_26, %c0_27, %c3, %c0_28], %57 {strides = array<i32>} : memref<1x3x9x256xf32, #tpu.memory_space<vmem>>, vector<1x1x1x256xf32>,
    %58 = vector.extract_strided_slice %8 {offsets = [1, 0, 0], sizes = [1, 1, 256], strides = [1, 1, 1]} : vector<3x9x256xf32> to vector<1x1x256xf32>
    %59 = vector.shape_cast %58 : vector<1x1x256xf32> to vector<256xf32>
    %60 = arith.addf %59, %25 : vector<256xf32>
    %cst_29 = arith.constant 8.000000e+00 : f32
    %61 = vector.broadcast %cst_29 : f32 to vector<256xf32>
    %62 = arith.mulf %60, %61 : vector<256xf32>
    %c0_30 = arith.constant 0 : index
    %c1_31 = arith.constant 1 : index
    %c0_32 = arith.constant 0 : index
    %c0_33 = arith.constant 0 : index
    %63 = vector.load %arg3[%c0_30, %c1_31, %c0_32, %c0_33] : memref<1x3x9x256xf32, #tpu.memory_space<vmem>>, vector<1x1x1x256xf32>
    %64 = vector.shape_cast %63 : vector<1x1x1x256xf32> to vector<256xf32>
    %65 = vector.shape_cast %62 : vector<256xf32> to vector<1x1x1x256xf32>
    tpu.vector_store %arg3[%c0_30, %c1_31, %c0_32, %c0_33], %65 {strides = array<i32>} : memref<1x3x9x256xf32, #tpu.memory_space<vmem>>, vector<1x1x1x256xf32>,
    %66 = vector.extract_strided_slice %8 {offsets = [1, 1, 0], sizes = [1, 1, 256], strides = [1, 1, 1]} : vector<3x9x256xf32> to vector<1x1x256xf32>
    %67 = vector.shape_cast %66 : vector<1x1x256xf32> to vector<256xf32>
    %68 = arith.addf %67, %22 : vector<256xf32>
    %cst_34 = arith.constant 8.000000e+00 : f32
    %69 = vector.broadcast %cst_34 : f32 to vector<256xf32>
    %70 = arith.mulf %68, %69 : vector<256xf32>
    %c0_35 = arith.constant 0 : index
    %c1_36 = arith.constant 1 : index
    %c1_37 = arith.constant 1 : index
    %c0_38 = arith.constant 0 : index
    %71 = vector.load %arg3[%c0_35, %c1_36, %c1_37, %c0_38] : memref<1x3x9x256xf32, #tpu.memory_space<vmem>>, vector<1x1x1x256xf32>
    %72 = vector.shape_cast %71 : vector<1x1x1x256xf32> to vector<256xf32>
    %73 = vector.shape_cast %70 : vector<256xf32> to vector<1x1x1x256xf32>
    tpu.vector_store %arg3[%c0_35, %c1_36, %c1_37, %c0_38], %73 {strides = array<i32>} : memref<1x3x9x256xf32, #tpu.memory_space<vmem>>, vector<1x1x1x256xf32>,
    %74 = vector.extract_strided_slice %1 {offsets = [1, 2, 0], sizes = [1, 1, 256], strides = [1, 1, 1]} : vector<3x9x256xf32> to vector<1x1x256xf32>
    %75 = vector.shape_cast %74 : vector<1x1x256xf32> to vector<256xf32>
    %76 = math.exp %75 : vector<256xf32>
    %cst_39 = arith.constant 1.600000e+01 : f32
    %77 = vector.broadcast %cst_39 : f32 to vector<256xf32>
    %78 = arith.mulf %76, %77 : vector<256xf32>
    %c0_40 = arith.constant 0 : index
    %c1_41 = arith.constant 1 : index
    %c2_42 = arith.constant 2 : index
    %c0_43 = arith.constant 0 : index
    %79 = vector.load %arg3[%c0_40, %c1_41, %c2_42, %c0_43] : memref<1x3x9x256xf32, #tpu.memory_space<vmem>>, vector<1x1x1x256xf32>
    %80 = vector.shape_cast %79 : vector<1x1x1x256xf32> to vector<256xf32>
    %81 = vector.shape_cast %78 : vector<256xf32> to vector<1x1x1x256xf32>
    tpu.vector_store %arg3[%c0_40, %c1_41, %c2_42, %c0_43], %81 {strides = array<i32>} : memref<1x3x9x256xf32, #tpu.memory_space<vmem>>, vector<1x1x1x256xf32>,
    %82 = vector.extract_strided_slice %1 {offsets = [1, 3, 0], sizes = [1, 1, 256], strides = [1, 1, 1]} : vector<3x9x256xf32> to vector<1x1x256xf32>
    %83 = vector.shape_cast %82 : vector<1x1x256xf32> to vector<256xf32>
    %84 = math.exp %83 : vector<256xf32>
    %cst_44 = arith.constant 3.000000e+01 : f32
    %85 = vector.broadcast %cst_44 : f32 to vector<256xf32>
    %86 = arith.mulf %84, %85 : vector<256xf32>
    %c0_45 = arith.constant 0 : index
    %c1_46 = arith.constant 1 : index
    %c3_47 = arith.constant 3 : index
    %c0_48 = arith.constant 0 : index
    %87 = vector.load %arg3[%c0_45, %c1_46, %c3_47, %c0_48] : memref<1x3x9x256xf32, #tpu.memory_space<vmem>>, vector<1x1x1x256xf32>
    %88 = vector.shape_cast %87 : vector<1x1x1x256xf32> to vector<256xf32>
    %89 = vector.shape_cast %86 : vector<256xf32> to vector<1x1x1x256xf32>
    tpu.vector_store %arg3[%c0_45, %c1_46, %c3_47, %c0_48], %89 {strides = array<i32>} : memref<1x3x9x256xf32, #tpu.memory_space<vmem>>, vector<1x1x1x256xf32>,
    %90 = vector.extract_strided_slice %8 {offsets = [2, 0, 0], sizes = [1, 1, 256], strides = [1, 1, 1]} : vector<3x9x256xf32> to vector<1x1x256xf32>
    %91 = vector.shape_cast %90 : vector<1x1x256xf32> to vector<256xf32>
    %92 = arith.addf %91, %25 : vector<256xf32>
    %cst_49 = arith.constant 8.000000e+00 : f32
    %93 = vector.broadcast %cst_49 : f32 to vector<256xf32>
    %94 = arith.mulf %92, %93 : vector<256xf32>
    %c0_50 = arith.constant 0 : index
    %c2_51 = arith.constant 2 : index
    %c0_52 = arith.constant 0 : index
    %c0_53 = arith.constant 0 : index
    %95 = vector.load %arg3[%c0_50, %c2_51, %c0_52, %c0_53] : memref<1x3x9x256xf32, #tpu.memory_space<vmem>>, vector<1x1x1x256xf32>
    %96 = vector.shape_cast %95 : vector<1x1x1x256xf32> to vector<256xf32>
    %97 = vector.shape_cast %94 : vector<256xf32> to vector<1x1x1x256xf32>
    tpu.vector_store %arg3[%c0_50, %c2_51, %c0_52, %c0_53], %97 {strides = array<i32>} : memref<1x3x9x256xf32, #tpu.memory_space<vmem>>, vector<1x1x1x256xf32>,
    %98 = vector.extract_strided_slice %8 {offsets = [2, 1, 0], sizes = [1, 1, 256], strides = [1, 1, 1]} : vector<3x9x256xf32> to vector<1x1x256xf32>
    %99 = vector.shape_cast %98 : vector<1x1x256xf32> to vector<256xf32>
    %100 = arith.addf %99, %22 : vector<256xf32>
    %cst_54 = arith.constant 8.000000e+00 : f32
    %101 = vector.broadcast %cst_54 : f32 to vector<256xf32>
    %102 = arith.mulf %100, %101 : vector<256xf32>
    %c0_55 = arith.constant 0 : index
    %c2_56 = arith.constant 2 : index
    %c1_57 = arith.constant 1 : index
    %c0_58 = arith.constant 0 : index
    %103 = vector.load %arg3[%c0_55, %c2_56, %c1_57, %c0_58] : memref<1x3x9x256xf32, #tpu.memory_space<vmem>>, vector<1x1x1x256xf32>
    %104 = vector.shape_cast %103 : vector<1x1x1x256xf32> to vector<256xf32>
    %105 = vector.shape_cast %102 : vector<256xf32> to vector<1x1x1x256xf32>
    tpu.vector_store %arg3[%c0_55, %c2_56, %c1_57, %c0_58], %105 {strides = array<i32>} : memref<1x3x9x256xf32, #tpu.memory_space<vmem>>, vector<1x1x1x256xf32>,
    %106 = vector.extract_strided_slice %1 {offsets = [2, 2, 0], sizes = [1, 1, 256], strides = [1, 1, 1]} : vector<3x9x256xf32> to vector<1x1x256xf32>
    %107 = vector.shape_cast %106 : vector<1x1x256xf32> to vector<256xf32>
    %108 = math.exp %107 : vector<256xf32>
    %cst_59 = arith.constant 3.300000e+01 : f32
    %109 = vector.broadcast %cst_59 : f32 to vector<256xf32>
    %110 = arith.mulf %108, %109 : vector<256xf32>
    %c0_60 = arith.constant 0 : index
    %c2_61 = arith.constant 2 : index
    %c2_62 = arith.constant 2 : index
    %c0_63 = arith.constant 0 : index
    %111 = vector.load %arg3[%c0_60, %c2_61, %c2_62, %c0_63] : memref<1x3x9x256xf32, #tpu.memory_space<vmem>>, vector<1x1x1x256xf32>
    %112 = vector.shape_cast %111 : vector<1x1x1x256xf32> to vector<256xf32>
    %113 = vector.shape_cast %110 : vector<256xf32> to vector<1x1x1x256xf32>
    tpu.vector_store %arg3[%c0_60, %c2_61, %c2_62, %c0_63], %113 {strides = array<i32>} : memref<1x3x9x256xf32, #tpu.memory_space<vmem>>, vector<1x1x1x256xf32>,
    %114 = vector.extract_strided_slice %1 {offsets = [2, 3, 0], sizes = [1, 1, 256], strides = [1, 1, 1]} : vector<3x9x256xf32> to vector<1x1x256xf32>
    %115 = vector.shape_cast %114 : vector<1x1x256xf32> to vector<256xf32>
    %116 = math.exp %115 : vector<256xf32>
    %cst_64 = arith.constant 2.300000e+01 : f32
    %117 = vector.broadcast %cst_64 : f32 to vector<256xf32>
    %118 = arith.mulf %116, %117 : vector<256xf32>
    %c0_65 = arith.constant 0 : index
    %c2_66 = arith.constant 2 : index
    %c3_67 = arith.constant 3 : index
    %c0_68 = arith.constant 0 : index
    %119 = vector.load %arg3[%c0_65, %c2_66, %c3_67, %c0_68] : memref<1x3x9x256xf32, #tpu.memory_space<vmem>>, vector<1x1x1x256xf32>
    %120 = vector.shape_cast %119 : vector<1x1x1x256xf32> to vector<256xf32>
    %121 = vector.shape_cast %118 : vector<256xf32> to vector<1x1x1x256xf32>
    tpu.vector_store %arg3[%c0_65, %c2_66, %c3_67, %c0_68], %121 {strides = array<i32>} : memref<1x3x9x256xf32, #tpu.memory_space<vmem>>, vector<1x1x1x256xf32>,
    return
  }
  func.func @transform_0(%arg0: i32, %arg1: i32) -> (i32, i32, i32, i32) {
    %c0_i32 = arith.constant 0 : i32
    %c0_i32_0 = arith.constant 0 : i32
    %c0_i32_1 = arith.constant 0 : i32
    return %arg0, %c0_i32, %c0_i32_0, %arg1 : i32, i32, i32, i32
  }
  func.func @transform_1(%arg0: i32, %arg1: i32) -> (i32, i32, i32, i32) {
    %c0_i32 = arith.constant 0 : i32
    %c0_i32_0 = arith.constant 0 : i32
    %c0_i32_1 = arith.constant 0 : i32
    return %arg0, %c0_i32, %c0_i32_0, %arg1 : i32, i32, i32, i32
  }
}

</mosaic_0001>

<bundles_post_ra>
// kernel: tpu_custom_call.1
= control target key start
LH: loop header
LB: loop body
LE: loop exit
PB: predicated region body
PF: predicated region fallthrough
CT: control target
= control target key end

     0   :  { %s772_s6 = smov 0   ;;  %s774_s7 = smov 0   ;;  %s975_s0 = inlined_call_operand.vmem [shape: f32[2,3,9,256], index: 0, kind: input, shape index: {}]   ;;  %s976_s1 = inlined_call_operand.vmem [shape: f32[2,3,9,256], index: 1, kind: output, shape index: {}]  }
   0x1   :  { %s776_s8 = smov 0  }
   0x2 LB: > { %s23_s9 = sadd.s32 1, %s755_s7  ;;  %p659_p0 = scmp.ge.s32.totalorder %s759_s8, 1  ;;  %s759_s8 = sphi %s776_s8, %s11_s8   ;;  %s755_s7 = sphi %s774_s7, %s980_s7   ;;  %s751_s6 = sphi %s772_s6, %s979_s6  }
   0x3   : > { %p25_p1 = scmp.ge.s32.totalorder %s23_s9, 2  ;;  %p108_p2 = scmp.lt.s32.totalorder %s759_s8, 3 }
   0x5   : > { %s982_s9 = smov (%p25_p1, %s23_s9), 0  ;;  %p109_p3 = pnand %p659_p0, %p108_p2 }
   0x6   : > { %p137_p4 = scmp.lt.s32.totalorder (!%p109_p3), %s751_s6, 1 }
   0x7   : > { %112 = sbr.rel (%p109_p3) target bundleno = 71 (0x47), region = 24 }
   0xc   : > { %v229_v0 = vlaneseq  ;;  %s984_s6 = smov (!%p137_p4, %s751_s6), 1  ;;  %v761_v34 = vmov 1966171168  }
   0xd   : > { %s675_s10 = smul.u32 96, %s984_s6  ;;  %v255_v35 = vunpack.c.l.s4 %v761_v34 }
   0xe   : > { %v793_v1 = vand.u32 127, %v229_v0  ;;  %v258_v46 = vshrl.u32 %v229_v0, 7  ;;  %vm878_vm0 = vcmp.lt.s32.totalorder %v229_v0, 256 }
   0xf   : > { %s805_s13 = scalar_lea.vmem %s975_s0, %s675_s10  ;;  %v256_v45 = vunpack.c.0.s8 %v255_v35  ;;  %s840_s16 = scalar_lea.vmem %s976_s1, %s675_s10 }
  0x10   : > { %v235_v2 = vcvt.s32.f32 %v793_v1  ;;  %v798_v3 = vadd.s32 128, %v793_v1  ;;  %v156_v5 = vld [vmem:[%s805_s13] sm:$0xff]  ;;  %v157_v6 = vld [vmem:[%s805_s13 + $0x8] sm:$0xff]  ;;  %v158_v25 = vld [vmem:[%s805_s13 + $0x10] sm:$0x1] }
  0x11   : > { %v160_v7 = vld [vmem:[%s805_s13 + $0x20] sm:$0xff]  ;;  %v168_v8 = vmul.f32 0.5, %v156_v5  ;;  %v301_v10 = vmul.f32 1.442695, %v156_v5  ;;  %v169_v11 = vmul.f32 0.5, %v157_v6  ;;  %v161_v13 = vld [vmem:[%s805_s13 + $0x28] sm:$0xff]  ;;  %v846_v59 = vsub.s32 %v256_v45, %v258_v46 }
  0x12   : > { %v236_v4 = vcvt.s32.f32 %v798_v3  ;;  %v237_v9 = vadd.f32 0.5, %v235_v2  ;;  %v303_v12 = vmul.f32 1.442695, %v157_v6  ;;  %v172_v15 = vmul.f32 0.5, %v160_v7  ;;  %v164_v17 = vld [vmem:[%s805_s13 + $0x40] sm:$0xff]  ;;  %v165_v21 = vld [vmem:[%s805_s13 + $0x48] sm:$0xff] }
  0x13   : > { %701 = vtanh.f32 %v168_v8  ;;  %v405_v16 = vmul.f32 1.442695, %v160_v7  ;;  %v173_v19 = vmul.f32 0.5, %v161_v13  ;;  %v407_v20 = vmul.f32 1.442695, %v161_v13 }
  0x14   : > { %v238_v14 = vadd.f32 0.5, %v236_v4  ;;  %703 = vpow2.f32 %v301_v10  ;;  %v239_v18 = vmul.f32 0.0625, %v237_v9  ;;  %v176_v23 = vmul.f32 0.5, %v164_v17  ;;  %v159_v28 = vld [vmem:[%s805_s13 + $0x18] sm:$0x1] }
  0x15   : > { %705 = vtanh.f32 %v169_v11  ;;  %v509_v24 = vmul.f32 1.442695, %v164_v17  ;;  %v177_v27 = vmul.f32 0.5, %v165_v21  ;;  %v511_v29 = vmul.f32 1.442695, %v165_v21 }
  0x16   : > { %707 = vpow2.f32 %v303_v12  ;;  %v240_v22 = vmul.f32 0.0625, %v238_v14  ;;  %v819_v26 = vfloor.f32 %v239_v18  ;;  %v162_v30 = vld [vmem:[%s805_s13 + $0x30] sm:$0x1]  ;;  %v170_v32 = vmul.f32 0.5, %v158_v25  ;;  %v163_v33 = vld [vmem:[%s805_s13 + $0x38] sm:$0x1] }
  0x17   : > { %709 = vtanh.f32 %v172_v15  ;;  %v171_v36 = vmul.f32 0.5, %v159_v28  ;;  %v166_v37 = vld [vmem:[%s805_s13 + $0x50] sm:$0x1]  ;;  %v174_v39 = vmul.f32 0.5, %v162_v30  ;;  %v167_v40 = vld [vmem:[%s805_s13 + $0x58] sm:$0x1] }
  0x18   : > { %711 = vpow2.f32 %v405_v16  ;;  %v823_v31 = vfloor.f32 %v240_v22  ;;  %v243_v38 = vmul.f32 16.0, %v819_v26  ;;  %v175_v41 = vmul.f32 0.5, %v163_v33 }
  0x19   : > { %713 = vtanh.f32 %v173_v19  ;;  %v178_v43 = vmul.f32 0.5, %v166_v37  ;;  %v179_v47 = vmul.f32 0.5, %v167_v40 }
  0x1a   : > { %715 = vpow2.f32 %v407_v20  ;;  %v244_v42 = vmul.f32 16.0, %v823_v31  ;;  %v833_v50 = vsub.f32 %v235_v2, %v243_v38 }
  0x1b   : > { %717 = vtanh.f32 %v176_v23 }
  0x1c   : > { %719 = vpow2.f32 %v509_v24  ;;  %v844_v57 = vsub.f32 %v236_v4, %v244_v42 }
  0x1d   : > { %721 = vtanh.f32 %v177_v27 }
  0x1e   : > { %723 = vpow2.f32 %v511_v29 }
  0x1f   : > { %725 = vtanh.f32 %v170_v32 }
  0x20   : > { %v702_v44 = vpop.eup %701  ;;  %727 = vtanh.f32 %v171_v36 }
  0x21   : > { %v704_v48 = vpop.eup %703  ;;  %v192_v49 = vmul.f32 0.5, %v702_v44  ;;  %729 = vtanh.f32 %v174_v39 }
  0x22   : > { %v706_v51 = vpop.eup %705  ;;  %731 = vtanh.f32 %v175_v41  ;;  %v305_v52 = vmul.f32 10.0, %v704_v48  ;;  %v329_v53 = vmul.f32 13.0, %v704_v48 }
  0x23   : > { %v708_v54 = vpop.eup %707  ;;  %v204_v55 = vadd.f32 0.5, %v192_v49  ;;  %v193_v56 = vmul.f32 0.5, %v706_v51  ;;  %733 = vtanh.f32 %v178_v43 }
  0x24   : > { %v710_v58 = vpop.eup %709  ;;  %735 = vtanh.f32 %v179_v47  ;;  %v306_v60 = vmul.f32 10.0, %v708_v54  ;;  %v330_v61 = vmul.f32 13.0, %v708_v54 }
  0x25   : > { %v712_v62 = vpop.eup %711  ;;  %216 = vst [vmem:[%s840_s16] sm:$0xff] %v204_v55  ;;  %v247_v63 = vadd.f32 %v833_v50, %v204_v55  ;;  %v275_v1 = vadd.f32 %v819_v26, %v204_v55  ;;  %v205_v2 = vadd.f32 0.5, %v193_v56  ;;  %v196_v5 = vmul.f32 0.5, %v710_v58 }
  0x26   : > { %v714_v6 = vpop.eup %713  ;;  %v309_v3 = vcombine.low %v305_v52, %v306_v60  ;;  %v333_v4 = vcombine.low %v329_v53, %v330_v61  ;;  %v851_v7 = vmul.f32 16.0, %v712_v62  ;;  %v853_v8 = vmul.f32 30.0, %v712_v62 }
  0x27   : > { %v855_v9 = vpop.eup %715  ;;  %v249_v10 = vmul.f32 8.0, %v247_v63  ;;  %v277_v11 = vmul.f32 8.0, %v275_v1  ;;  %217 = vst [vmem:[%s840_s16 + $0x8] sm:$0xff] %v205_v2  ;;  %v248_v12 = vadd.f32 %v844_v57, %v205_v2  ;;  %v276_v13 = vadd.f32 %v823_v31, %v205_v2 }
  0x28   : > { %v718_v14 = vpop.eup %717  ;;  %v208_v15 = vadd.f32 0.5, %v196_v5  ;;  %v197_v16 = vmul.f32 0.5, %v714_v6  ;;  %v316_v17 = vrot.slane %v309_v3, %v846_v59  ;;  %v862_v18 = vrot.slane %v333_v4, %v846_v59 }
  0x29   : > { %v864_v19 = vpop.eup %719  ;;  %v250_v20 = vmul.f32 8.0, %v248_v12  ;;  %v278_v21 = vmul.f32 8.0, %v276_v13  ;;  %v200_v22 = vmul.f32 0.5, %v718_v14  ;;  %v867_v23 = vmul.f32 16.0, %v855_v9 }
  0x2a   : > { %v722_v24 = vpop.eup %721  ;;  %220 = vst [vmem:[%s840_s16 + $0x20] sm:$0xff] %v208_v15  ;;  %v354_v25 = vadd.f32 %v833_v50, %v208_v15  ;;  %v379_v27 = vadd.f32 %v819_v26, %v208_v15  ;;  %v209_v28 = vadd.f32 0.5, %v197_v16  ;;  %v873_v29 = vrot.slane %v316_v17, %v846_v59 }
  0x2b   : > { %v875_v30 = vpop.eup %723  ;;  %v253_v33 = vcombine.low %v249_v10, %v250_v20  ;;  %v281_v34 = vcombine.low %v277_v11, %v278_v21  ;;  %v212_v35 = vadd.f32 0.5, %v200_v22  ;;  %v201_v36 = vmul.f32 0.5, %v722_v24 }
  0x2c   : > { %v726_v37 = vpop.eup %725  ;;  %v356_v38 = vmul.f32 8.0, %v354_v25  ;;  %v381_v39 = vmul.f32 8.0, %v379_v27  ;;  %221 = vst [vmem:[%s840_s16 + $0x28] sm:$0xff] %v209_v28  ;;  %v355_v40 = vadd.f32 %v844_v57, %v209_v28  ;;  %v380_v41 = vadd.f32 %v823_v31, %v209_v28 }
  0x2d   : > { %v728_v42 = vpop.eup %727  ;;  %v260_v43 = vrot.slane %v253_v33, %v846_v59  ;;  %v288_v0 = vrot.slane %v281_v34, %v846_v59  ;;  %224 = vst [vmem:[%s840_s16 + $0x40] sm:$0xff] %v212_v35  ;;  %v458_v44 = vadd.f32 %v833_v50, %v212_v35  ;;  %v483_v45 = vadd.f32 %v819_v26, %v212_v35 }
  0x2e   : > { %v730_v46 = vpop.eup %729  ;;  %v357_v47 = vmul.f32 8.0, %v355_v40  ;;  %v382_v48 = vmul.f32 8.0, %v380_v41  ;;  %v213_v49 = vadd.f32 0.5, %v201_v36  ;;  %v194_v51 = vmul.f32 0.5, %v726_v37 }
  0x2f   : > { %v732_v52 = vpop.eup %731  ;;  %v289_v53 = vcombine.high %v288_v0, %v288_v0  ;;  %v460_v54 = vmul.f32 8.0, %v458_v44  ;;  %v485_v55 = vmul.f32 8.0, %v483_v45  ;;  %v195_v56 = vmul.f32 0.5, %v728_v42 }
  0x30   : > { %v734_v58 = vpop.eup %733  ;;  %v360_v60 = vcombine.low %v356_v38, %v357_v47  ;;  %v385_v61 = vcombine.low %v381_v39, %v382_v48  ;;  %225 = vst [vmem:[%s840_s16 + $0x48] sm:$0xff] %v213_v49  ;;  %v459_v50 = vadd.f32 %v844_v57, %v213_v49  ;;  %v484_v26 = vadd.f32 %v823_v31, %v213_v49 }
  0x31   : > { %v736_v62 = vpop.eup %735  ;;  %v206_v63 = vadd.f32 0.5, %v194_v51  ;;  %v207_v1 = vadd.f32 0.5, %v195_v56  ;;  %v198_v2 = vmul.f32 0.5, %v730_v46  ;;  %v199_v5 = vmul.f32 0.5, %v732_v52 }
  0x32   : > { %v367_v6 = vrot.slane %v360_v60, %v846_v59  ;;  %v392_v3 = vrot.slane %v385_v61, %v846_v59  ;;  %v461_v4 = vmul.f32 8.0, %v459_v50  ;;  %v486_v10 = vmul.f32 8.0, %v484_v26 }
  0x33   : > { %218 = vst [vmem:[%s840_s16 + $0x10] sm:$0x1] %v206_v63  ;;  %219 = vst [vmem:[%s840_s16 + $0x18] sm:$0x1] %v207_v1  ;;  %v210_v11 = vadd.f32 0.5, %v198_v2  ;;  %v211_v57 = vadd.f32 0.5, %v199_v5  ;;  %v267_v16 = vrot.slane %v260_v43, %v846_v59  ;;  %v296_v21 = vrot.slane %v289_v53, %v846_v59 }
  0x34   : > { %v202_v12 = vmul.f32 0.5, %v734_v58  ;;  %v203_v31 = vmul.f32 0.5, %v736_v62  ;;  %v393_v13 = vcombine.high %v392_v3, %v392_v3  ;;  %v464_v14 = vcombine.low %v460_v54, %v461_v4 }
  0x35   : > { %v489_v15 = vcombine.low %v485_v55, %v486_v10  ;;  %222 = vst [vmem:[%s840_s16 + $0x30] sm:$0x1] %v210_v11  ;;  %223 = vst [vmem:[%s840_s16 + $0x38] sm:$0x1] %v211_v57  ;;  %v324_v22 = vcombine.high %v873_v29, %v873_v29  ;;  %v341_v27 = vcombine.high %v862_v18, %v862_v18  ;;  %v434_v34 = vmul.f32 30.0, %v855_v9 }
  0x36   : > { %v214_v17 = vadd.f32 0.5, %v202_v12  ;;  %v215_v20 = vadd.f32 0.5, %v203_v31  ;;  %v471_v24 = vrot.slane %v464_v14, %v846_v59  ;;  %273 = vst.msk [vmem:[%s840_s16] ss:$8 sm:$0x3] %vm878_vm0, %v267_v16  ;;  %v374_v28 = vrot.slane %v367_v6, %v846_v59 }
  0x37   : > { %v496_v25 = vrot.slane %v489_v15, %v846_v59  ;;  %662 = vst.msk [vmem:[%s840_s16 + $0x1] ss:$8 sm:$0x3] %vm878_vm0, %v296_v21  ;;  %663 = vst.msk [vmem:[%s840_s16 + $0x2] ss:$8 sm:$0x3] %vm878_vm0, %v324_v22  ;;  %v400_v29 = vrot.slane %v393_v13, %v846_v59  ;;  %v413_v33 = vcombine.low %v851_v7, %v867_v23 }
  0x38   : > { %226 = vst [vmem:[%s840_s16 + $0x50] sm:$0x1] %v214_v17  ;;  %227 = vst [vmem:[%s840_s16 + $0x58] sm:$0x1] %v215_v20  ;;  %v513_v18 = vmul.f32 33.0, %v864_v19  ;;  %v348_v36 = vrot.slane %v341_v27, %v846_v59  ;;  %v478_v37 = vrot.slane %v471_v24, %v846_v59  ;;  %v514_v38 = vmul.f32 33.0, %v875_v30 }
  0x39   : > { %v497_v35 = vcombine.high %v496_v25, %v496_v25  ;;  %665 = vst.msk [vmem:[%s840_s16 + $0x20] ss:$8 sm:$0x3] %vm878_vm0, %v374_v28  ;;  %666 = vst.msk [vmem:[%s840_s16 + $0x21] ss:$8 sm:$0x3] %vm878_vm0, %v400_v29  ;;  %v420_v7 = vrot.slane %v413_v33, %v846_v59  ;;  %v437_v9 = vcombine.low %v853_v8, %v434_v34 }
  0x3a   : > { %v537_v23 = vmul.f32 23.0, %v864_v19  ;;  %v538_v39 = vmul.f32 23.0, %v875_v30  ;;  %v349_v40 = vcombine.high %v348_v36, %v348_v36  ;;  %669 = vst.msk [vmem:[%s840_s16 + $0x40] ss:$8 sm:$0x3] %vm878_vm0, %v478_v37  ;;  %v517_v42 = vcombine.low %v513_v18, %v514_v38 }
  0x3b   : > { %v504_v41 = vrot.slane %v497_v35, %v846_v59  ;;  %v427_v43 = vrot.slane %v420_v7, %v846_v59  ;;  %v444_v0 = vrot.slane %v437_v9, %v846_v59 }
  0x3c   : > { %v541_v44 = vcombine.low %v537_v23, %v538_v39  ;;  %664 = vst.msk [vmem:[%s840_s16 + $0x3] ss:$8 sm:$0x3] %vm878_vm0, %v349_v40  ;;  %v524_v8 = vrot.slane %v517_v42, %v846_v59 }
  0x3d   : > { %670 = vst.msk [vmem:[%s840_s16 + $0x41] ss:$8 sm:$0x3] %vm878_vm0, %v504_v41  ;;  %v428_v19 = vcombine.high %v427_v43, %v427_v43  ;;  %v445_v30 = vcombine.high %v444_v0, %v444_v0 }
  0x3e   : > { %v548_v45 = vrot.slane %v541_v44, %v846_v59  ;;  %v531_v46 = vrot.slane %v524_v8, %v846_v59 }
  0x3f   : > { %667 = vst.msk [vmem:[%s840_s16 + $0x22] ss:$8 sm:$0x3] %vm878_vm0, %v428_v19  ;;  %v452_v47 = vrot.slane %v445_v30, %v846_v59 }
  0x40   : > { %v549_v48 = vcombine.high %v548_v45, %v548_v45  ;;  %v532_v49 = vcombine.high %v531_v46, %v531_v46 }
  0x41   : > { %v453_v51 = vcombine.high %v452_v47, %v452_v47 }
  0x42   : > { %v556_v52 = vrot.slane %v549_v48, %v846_v59  ;;  %671 = vst.msk [vmem:[%s840_s16 + $0x42] ss:$8 sm:$0x3] %vm878_vm0, %v532_v49 }
  0x43   : > { %668 = vst.msk [vmem:[%s840_s16 + $0x23] ss:$8 sm:$0x3] %vm878_vm0, %v453_v51 }
  0x44   : > { %v557_v53 = vcombine.high %v556_v52, %v556_v52 }
  0x46   : > { %672 = vst.msk [vmem:[%s840_s16 + $0x43] ss:$8 sm:$0x3] %vm878_vm0, %v557_v53 }
  0x47 PF: > { %s11_s8 = sadd.s32 1, %s759_s8   ;;  %s979_s6 = smov %s755_s7 }
  0x48   : > { %p8_p5 = scmp.ge.s32.totalorder %s11_s8, 4   ;;  %s980_s7 = smov %s982_s9 }
  0x4a   :  { %10 = sbr.rel (!%p8_p5) target bundleno = 2 (0x2), region = 65 }

</bundles_post_ra>
